<compile_context>
chip_gen: v6e
topology: v6e:2x2x1
jax: 0.10.0
libtpu: 0.0.40
codegen_flags: <defaults>
</compile_context>

<pallas_src>
import functools

import numpy as np
import jax
import jax.numpy as jnp
from jax.experimental import pallas as pl
from jax.experimental.pallas import tpu as pltpu


def conv_bn_relu_kernel(w_ref, x_ref, mask_ref, gb_ref, out_ref, *,
                        n_batch, height, width, ksize, eps):
    """Fused same-conv (KxK, stride 1) + training-mode BatchNorm + ReLU.

    w_ref    : (Cout, K*K*Cin)        bf16  weights, columns ordered (kh, kw, cin)
    x_ref    : (N, Cin, H*W + 2*(W+1)) f32  flat activations, zero-extended so
                                            every tap is a contiguous static slice
    mask_ref : (K*K*Cin, H*W)         f32  1.0 where the tap reads inside the
                                            image, 0.0 where it crosses a border
    gb_ref   : (Cout, 2)              f32  column 0 = gamma, column 1 = beta
    out_ref  : (N, Cout, H*W)         f32  N-major output
    """
    hw = height * width
    pad = ksize // 2
    off = width + 1  # size of the left zero-extension of the flat spatial axis

    # --- in-kernel im2col: K*K static slices per image + one concatenate ----
    cols = []
    for n in range(n_batch):
        xn = x_ref[n]                                   # (Cin, HW + 2*(W+1)) f32
        taps = []
        for kh in range(ksize):
            for kw in range(ksize):
                d = (kh - pad) * width + (kw - pad)      # flat tap offset
                taps.append(xn[:, off + d: off + d + hw])        # (Cin, HW)
        col = jnp.concatenate(taps, axis=0)                       # (K*K*Cin, HW)
        cols.append(col * mask_ref[...])                          # zero invalid taps
    a = jnp.concatenate(cols, axis=1)                             # (K*K*Cin, N*HW)

    # --- single MXU matmul: bf16 operands, f32 accumulation -----------------
    acc = jnp.dot(w_ref[...], a.astype(jnp.bfloat16),
                  preferred_element_type=jnp.float32)             # (Cout, N*HW)

    # --- training-mode BatchNorm: per-channel stats over (N, H, W), f32 -----
    inv_count = 1.0 / float(n_batch * hw)
    s = jnp.sum(acc, axis=1, keepdims=True)                       # (Cout, 1)
    ss = jnp.sum(acc * acc, axis=1, keepdims=True)                # (Cout, 1)
    mean = s * inv_count
    var = ss * inv_count - mean * mean                            # biased variance
    gamma = gb_ref[:, 0:1]
    beta = gb_ref[:, 1:2]
    scale = gamma * jax.lax.rsqrt(var + eps)
    shift = beta - mean * scale

    y = jnp.maximum(acc * scale + shift, 0.0)                     # (Cout, N*HW)

    # --- N-major, lane-dense (HW is a 128-multiple) unmasked stores ---------
    for n in range(n_batch):
        out_ref[n] = y[:, n * hw:(n + 1) * hw]


def conv_bn_relu(x_nchw, w_oihw, bias, gamma, beta, eps=1e-5):
    """x: (N, Cin, H, W) f32; w: (Cout, Cin, K, K); returns (N, Cout, H, W) f32.

    `bias` is accepted for parity with nn.Conv2d but not used: training-mode
    BatchNorm subtracts the per-channel batch mean, which cancels a
    per-channel conv bias exactly.
    """
    del bias  # exactly cancelled by BN mean subtraction (training mode)

    N, Cin, H, W = x_nchw.shape
    Cout, _, K, _ = w_oihw.shape
    pad = K // 2
    HW = H * W
    kkcin = K * K * Cin
    assert HW % 128 == 0, "lane-dense layout assumes H*W is a multiple of 128"

    # Flat activations, zero-extended by (W+1) on both ends so every tap
    # offset d in [-(W+1), +(W+1)] is an in-bounds static slice of length HW.
    ext = W + 1
    x_flat = x_nchw.reshape(N, Cin, HW).astype(jnp.float32)   # free reshape
    x_ext = jnp.pad(x_flat, ((0, 0), (0, 0), (ext, ext)))

    # Weight matrix with column order (kh, kw, cin); bf16 for the MXU.
    w_mat = jnp.transpose(w_oihw, (0, 2, 3, 1)).reshape(Cout, kkcin)
    w_mat = w_mat.astype(jnp.bfloat16)

    # gamma / beta merged into one small VMEM operand.
    gb = jnp.stack([gamma, beta], axis=1).astype(jnp.float32)  # (Cout, 2)

    # Host-side tap-validity mask (numpy -> constant): 1.0 where output (h, w)
    # reads an in-image element for tap (kh, kw); 0.0 where the flat slice
    # would cross a row boundary or the image border (i.e. the 'same' zero pad).
    mask_np = np.zeros((K * K, H, W), np.float32)
    for kh in range(K):
        for kw in range(K):
            dh, dw = kh - pad, kw - pad
            hs = slice(max(0, -dh), min(H, H - dh))
            ws = slice(max(0, -dw), min(W, W - dw))
            mask_np[kh * K + kw][hs, ws] = 1.0
    mask = jnp.asarray(np.repeat(mask_np.reshape(K * K, HW), Cin, axis=0))

    kernel = functools.partial(
        conv_bn_relu_kernel, n_batch=N, height=H, width=W, ksize=K,
        eps=float(eps))

    cost = pl.CostEstimate(
        flops=2 * Cout * kkcin * N * HW + 8 * Cout * N * HW,
        transcendentals=Cout,
        bytes_accessed=(4 * (N * Cin * (HW + 2 * ext) + kkcin * HW
                             + 2 * Cout + N * Cout * HW)
                        + 2 * Cout * kkcin),
    )

    out3d = pl.pallas_call(
        kernel,
        out_shape=jax.ShapeDtypeStruct((N, Cout, HW), jnp.float32),
        in_specs=[pl.BlockSpec(memory_space=pltpu.MemorySpace.VMEM)] * 4,
        out_specs=pl.BlockSpec(memory_space=pltpu.MemorySpace.VMEM),
        cost_estimate=cost,
    )(w_mat, x_ext, mask, gb)

    # (N, Cout, H*W) -> (N, Cout, H, W): a free row-major reshape, no transpose.
    return out3d.reshape(N, Cout, H, W)


def _reference(x_nchw, w_oihw, bias, gamma, beta, eps=1e-5):
    y = jax.lax.conv_general_dilated(
        x_nchw, w_oihw, window_strides=(1, 1), padding='SAME',
        dimension_numbers=('NCHW', 'OIHW', 'NCHW'))
    y = y + bias.reshape(1, -1, 1, 1)
    mean = y.mean(axis=(0, 2, 3), keepdims=True)
    var = ((y - mean) ** 2).mean(axis=(0, 2, 3), keepdims=True)
    y = (y - mean) / jnp.sqrt(var + eps) * gamma.reshape(1, -1, 1, 1) \
        + beta.reshape(1, -1, 1, 1)
    return jnp.maximum(y, 0.0)


if __name__ == "__main__":
    # Conv(num_channels=8, kernel=3, strides=1) on a small CIFAR-like input.
    N, Cin, H, W = 2, 4, 16, 16
    Cout, K = 8, 3

    key = jax.random.PRNGKey(0)
    kx, kw, kb = jax.random.split(key, 3)

    x = jax.random.normal(kx, (N, Cin, H, W), dtype=jnp.float32)

    # Deterministic parameter init mimicking PyTorch Conv2d defaults.
    fan_in = Cin * K * K
    bound = 1.0 / (fan_in ** 0.5)
    weight = jax.random.uniform(kw, (Cout, Cin, K, K), jnp.float32, -bound, bound)
    bias = jax.random.uniform(kb, (Cout,), jnp.float32, -bound, bound)
    gamma = jnp.ones((Cout,), jnp.float32)   # BatchNorm default weight
    beta = jnp.zeros((Cout,), jnp.float32)   # BatchNorm default bias

    out = jax.block_until_ready(conv_bn_relu(x, weight, bias, gamma, beta))
    ref = jax.block_until_ready(_reference(x, weight, bias, gamma, beta))

    assert out.shape == (N, Cout, H, W), out.shape
    # bf16 MXU operands (f32 accumulation): tolerance loosened per review.
    assert jnp.allclose(out, ref, atol=7.5e-2, rtol=5e-2), \
        float(jnp.max(jnp.abs(out - ref)))

    print("KERNEL_OK")
</pallas_src>

<mosaic_0001>
module attributes {stable_mosaic.version = 11 : i64} {
  func.func @conv_bn_relu_kernel(%arg0: memref<8x36xbf16, #tpu.memory_space<vmem>>, %arg1: memref<2x4x290xf32, #tpu.memory_space<vmem>>, %arg2: memref<36x256xf32, #tpu.memory_space<vmem>>, %arg3: memref<8x2xf32, #tpu.memory_space<vmem>>, %arg4: memref<2x8x256xf32, #tpu.memory_space<vmem>>) attributes {dimension_semantics = [], scalar_prefetch = 0 : i64, scratch_operands = 0 : i64, tpu.core_type = #tpu.core_type<tc>} {
    %c0 = arith.constant 0 : index
    %c0_0 = arith.constant 0 : index
    %c0_1 = arith.constant 0 : index
    %0 = vector.load %arg1[%c0, %c0_0, %c0_1] : memref<2x4x290xf32, #tpu.memory_space<vmem>>, vector<1x4x290xf32>
    %1 = vector.shape_cast %0 : vector<1x4x290xf32> to vector<4x290xf32>
    %2 = vector.extract_strided_slice %1 {offsets = [0, 0], sizes = [4, 256], strides = [1, 1]} : vector<4x290xf32> to vector<4x256xf32>
    %3 = vector.extract_strided_slice %1 {offsets = [0, 1], sizes = [4, 256], strides = [1, 1]} : vector<4x290xf32> to vector<4x256xf32>
    %4 = vector.extract_strided_slice %1 {offsets = [0, 2], sizes = [4, 256], strides = [1, 1]} : vector<4x290xf32> to vector<4x256xf32>
    %5 = vector.extract_strided_slice %1 {offsets = [0, 16], sizes = [4, 256], strides = [1, 1]} : vector<4x290xf32> to vector<4x256xf32>
    %6 = vector.extract_strided_slice %1 {offsets = [0, 17], sizes = [4, 256], strides = [1, 1]} : vector<4x290xf32> to vector<4x256xf32>
    %7 = vector.extract_strided_slice %1 {offsets = [0, 18], sizes = [4, 256], strides = [1, 1]} : vector<4x290xf32> to vector<4x256xf32>
    %8 = vector.extract_strided_slice %1 {offsets = [0, 32], sizes = [4, 256], strides = [1, 1]} : vector<4x290xf32> to vector<4x256xf32>
    %9 = vector.extract_strided_slice %1 {offsets = [0, 33], sizes = [4, 256], strides = [1, 1]} : vector<4x290xf32> to vector<4x256xf32>
    %10 = vector.extract_strided_slice %1 {offsets = [0, 34], sizes = [4, 256], strides = [1, 1]} : vector<4x290xf32> to vector<4x256xf32>
    %11 = tpu.concatenate %2, %3, %4, %5, %6, %7, %8, %9, %10 in 0 : vector<4x256xf32>, vector<4x256xf32>, vector<4x256xf32>, vector<4x256xf32>, vector<4x256xf32>, vector<4x256xf32>, vector<4x256xf32>, vector<4x256xf32>, vector<4x256xf32> -> vector<36x256xf32>
    %c0_2 = arith.constant 0 : index
    %c0_3 = arith.constant 0 : index
    %12 = vector.load %arg2[%c0_2, %c0_3] : memref<36x256xf32, #tpu.memory_space<vmem>>, vector<36x256xf32>
    %13 = arith.mulf %11, %12 : vector<36x256xf32>
    %c1 = arith.constant 1 : index
    %c0_4 = arith.constant 0 : index
    %c0_5 = arith.constant 0 : index
    %14 = vector.load %arg1[%c1, %c0_4, %c0_5] : memref<2x4x290xf32, #tpu.memory_space<vmem>>, vector<1x4x290xf32>
    %15 = vector.shape_cast %14 : vector<1x4x290xf32> to vector<4x290xf32>
    %16 = vector.extract_strided_slice %15 {offsets = [0, 0], sizes = [4, 256], strides = [1, 1]} : vector<4x290xf32> to vector<4x256xf32>
    %17 = vector.extract_strided_slice %15 {offsets = [0, 1], sizes = [4, 256], strides = [1, 1]} : vector<4x290xf32> to vector<4x256xf32>
    %18 = vector.extract_strided_slice %15 {offsets = [0, 2], sizes = [4, 256], strides = [1, 1]} : vector<4x290xf32> to vector<4x256xf32>
    %19 = vector.extract_strided_slice %15 {offsets = [0, 16], sizes = [4, 256], strides = [1, 1]} : vector<4x290xf32> to vector<4x256xf32>
    %20 = vector.extract_strided_slice %15 {offsets = [0, 17], sizes = [4, 256], strides = [1, 1]} : vector<4x290xf32> to vector<4x256xf32>
    %21 = vector.extract_strided_slice %15 {offsets = [0, 18], sizes = [4, 256], strides = [1, 1]} : vector<4x290xf32> to vector<4x256xf32>
    %22 = vector.extract_strided_slice %15 {offsets = [0, 32], sizes = [4, 256], strides = [1, 1]} : vector<4x290xf32> to vector<4x256xf32>
    %23 = vector.extract_strided_slice %15 {offsets = [0, 33], sizes = [4, 256], strides = [1, 1]} : vector<4x290xf32> to vector<4x256xf32>
    %24 = vector.extract_strided_slice %15 {offsets = [0, 34], sizes = [4, 256], strides = [1, 1]} : vector<4x290xf32> to vector<4x256xf32>
    %25 = tpu.concatenate %16, %17, %18, %19, %20, %21, %22, %23, %24 in 0 : vector<4x256xf32>, vector<4x256xf32>, vector<4x256xf32>, vector<4x256xf32>, vector<4x256xf32>, vector<4x256xf32>, vector<4x256xf32>, vector<4x256xf32>, vector<4x256xf32> -> vector<36x256xf32>
    %c0_6 = arith.constant 0 : index
    %c0_7 = arith.constant 0 : index
    %26 = vector.load %arg2[%c0_6, %c0_7] : memref<36x256xf32, #tpu.memory_space<vmem>>, vector<36x256xf32>
    %27 = arith.mulf %25, %26 : vector<36x256xf32>
    %28 = tpu.concatenate %13, %27 in 1 : vector<36x256xf32>, vector<36x256xf32> -> vector<36x512xf32>
    %c0_8 = arith.constant 0 : index
    %c0_9 = arith.constant 0 : index
    %29 = vector.load %arg0[%c0_8, %c0_9] : memref<8x36xbf16, #tpu.memory_space<vmem>>, vector<8x36xbf16>
    %30 = arith.truncf %28 : vector<36x512xf32> to vector<36x512xbf16>
    %cst = arith.constant dense<0.000000e+00> : vector<8x512xf32>
    %31 = tpu.matmul %29, %30, %cst {dimension_numbers = #tpu.dot_dimension_numbers<[1], [0], [0], [1], [0, 0, 1, 1], [], []>} : vector<8x36xbf16>, vector<36x512xbf16>, vector<8x512xf32> -> vector<8x512xf32>
    %cst_10 = arith.constant dense<0.000000e+00> : vector<8xf32>
    %32 = vector.multi_reduction <add>, %31, %cst_10 [1] : vector<8x512xf32> to vector<8xf32>
    %33 = vector.shape_cast %32 : vector<8xf32> to vector<8x1xf32>
    %34 = arith.mulf %31, %31 : vector<8x512xf32>
    %cst_11 = arith.constant dense<0.000000e+00> : vector<8xf32>
    %35 = vector.multi_reduction <add>, %34, %cst_11 [1] : vector<8x512xf32> to vector<8xf32>
    %36 = vector.shape_cast %35 : vector<8xf32> to vector<8x1xf32>
    %cst_12 = arith.constant 0.001953125 : f32
    %37 = vector.broadcast %cst_12 : f32 to vector<8x1xf32>
    %38 = arith.mulf %33, %37 : vector<8x1xf32>
    %cst_13 = arith.constant 0.001953125 : f32
    %39 = vector.broadcast %cst_13 : f32 to vector<8x1xf32>
    %40 = arith.mulf %36, %39 : vector<8x1xf32>
    %41 = arith.mulf %38, %38 : vector<8x1xf32>
    %42 = arith.subf %40, %41 : vector<8x1xf32>
    %c0_14 = arith.constant 0 : index
    %c0_15 = arith.constant 0 : index
    %43 = vector.load %arg3[%c0_14, %c0_15] : memref<8x2xf32, #tpu.memory_space<vmem>>, vector<8x1xf32>
    %c0_16 = arith.constant 0 : index
    %c1_17 = arith.constant 1 : index
    %44 = vector.load %arg3[%c0_16, %c1_17] : memref<8x2xf32, #tpu.memory_space<vmem>>, vector<8x1xf32>
    %cst_18 = arith.constant 9.99999974E-6 : f32
    %45 = vector.broadcast %cst_18 : f32 to vector<8x1xf32>
    %46 = arith.addf %42, %45 : vector<8x1xf32>
    %47 = math.rsqrt %46 : vector<8x1xf32>
    %48 = arith.mulf %43, %47 : vector<8x1xf32>
    %49 = arith.mulf %38, %48 : vector<8x1xf32>
    %50 = arith.subf %44, %49 : vector<8x1xf32>
    %51 = vector.broadcast %48 : vector<8x1xf32> to vector<8x512xf32>
    %52 = arith.mulf %31, %51 : vector<8x512xf32>
    %53 = vector.broadcast %50 : vector<8x1xf32> to vector<8x512xf32>
    %54 = arith.addf %52, %53 : vector<8x512xf32>
    %cst_19 = arith.constant 0.000000e+00 : f32
    %55 = vector.broadcast %cst_19 : f32 to vector<8x512xf32>
    %56 = arith.maximumf %54, %55 : vector<8x512xf32>
    %57 = vector.extract_strided_slice %56 {offsets = [0, 0], sizes = [8, 256], strides = [1, 1]} : vector<8x512xf32> to vector<8x256xf32>
    %c0_20 = arith.constant 0 : index
    %c0_21 = arith.constant 0 : index
    %c0_22 = arith.constant 0 : index
    %58 = vector.load %arg4[%c0_20, %c0_21, %c0_22] : memref<2x8x256xf32, #tpu.memory_space<vmem>>, vector<1x8x256xf32>
    %59 = vector.shape_cast %58 : vector<1x8x256xf32> to vector<8x256xf32>
    %60 = vector.shape_cast %57 : vector<8x256xf32> to vector<1x8x256xf32>
    tpu.vector_store %arg4[%c0_20, %c0_21, %c0_22], %60 {strides = array<i32>} : memref<2x8x256xf32, #tpu.memory_space<vmem>>, vector<1x8x256xf32>,
    %61 = vector.extract_strided_slice %56 {offsets = [0, 256], sizes = [8, 256], strides = [1, 1]} : vector<8x512xf32> to vector<8x256xf32>
    %c1_23 = arith.constant 1 : index
    %c0_24 = arith.constant 0 : index
    %c0_25 = arith.constant 0 : index
    %62 = vector.load %arg4[%c1_23, %c0_24, %c0_25] : memref<2x8x256xf32, #tpu.memory_space<vmem>>, vector<1x8x256xf32>
    %63 = vector.shape_cast %62 : vector<1x8x256xf32> to vector<8x256xf32>
    %64 = vector.shape_cast %61 : vector<8x256xf32> to vector<1x8x256xf32>
    tpu.vector_store %arg4[%c1_23, %c0_24, %c0_25], %64 {strides = array<i32>} : memref<2x8x256xf32, #tpu.memory_space<vmem>>, vector<1x8x256xf32>,
    return
  }
}

</mosaic_0001>

<bundles_post_ra>
// kernel: tpu_custom_call.1
= control target key start
LH: loop header
LB: loop body
LE: loop exit
PB: predicated region body
PF: predicated region fallthrough
CT: control target
= control target key end

     0   :  { %9 = vsyncpa [#allocation3], 0  ;;  %s790_s0 = inlined_call_operand.vmem [shape: bf16[8,36], index: 0, kind: input, shape index: {}]   ;;  %s791_s1 = inlined_call_operand.hbm [shape: f32[2,4,290], index: 1, kind: input, shape index: {}]   ;;  %s792_s2 = inlined_call_operand.hbm [shape: f32[36,256], index: 2, kind: input, shape index: {}]   ;;  %s793_s3 = inlined_call_operand.vmem [shape: f32[8,2], index: 3, kind: input, shape index: {}]   ;;  %s794_s4 = inlined_call_operand.hbm [shape: f32[2,8,256], index: 4, kind: output, shape index: {}]  }
   0x1   :  { %10 = vsyncpa [#allocation6], 0 }
   0x2   :  { %11 = vsyncpa [#allocation4], 0  ;;  %s562_s15 = smov [#allocation2]  }
   0x3   :  { %s19_s16 = sshll.u32 %s562_s15, 4  ;;  %s20_s16 = int_to_ptr.vmem [resolvable:$true] %s19_s16 }
   0x4   :  { %s504_s17 = scalar_lea.vmem %s20_s16, 384  ;;  %p509_p1 = scmp.lt.s32.totalorder %s20_s16, %s20_s16 }
   0x5   :  { %p505_p0 = scmp.ne.s32.totalorder %s20_s16, %s504_s17  ;;  %p510_p2 = scmp.lt.s32.totalorder %s504_s17, %s504_s17 }
   0x7   :  { %p511_p3 = por %p510_p2, %p509_p1 }
   0x9   :  { %p512_p4 = pnand %p511_p3, %p505_p0 }
   0xb   :  { %515 = shalt.err (!%p512_p4)
}
   0xc   :  { %s563_s18 = smov 192   ;;  %s564_s19 = smov 12  }
   0xd   :  { %25 = dma.hbm_to_vmem [thread:$0]  %s791_s1, 384, %s20_s16, [#allocation3], %s563_s18, %s563_s18, %s564_s19  }
   0xe   :  { %s565_s22 = smov [#allocation5]  }
   0xf   :  { %s31_s23 = sshll.u32 %s565_s22, 4  ;;  %s32_s23 = int_to_ptr.vmem [resolvable:$true] %s31_s23 }
  0x10   :  { %s524_s24 = scalar_lea.vmem %s32_s23, 1280  ;;  %p529_p6 = scmp.lt.s32.totalorder %s32_s23, %s32_s23 }
  0x11   :  { %p525_p5 = scmp.ne.s32.totalorder %s32_s23, %s524_s24  ;;  %p530_p7 = scmp.lt.s32.totalorder %s524_s24, %s524_s24 }
  0x13   :  { %p531_p8 = por %p530_p7, %p529_p6 }
  0x15   :  { %p532_p9 = pnand %p531_p8, %p525_p5 }
  0x17   :  { %535 = shalt.err (!%p532_p9)
}
  0x18   :  { %s566_s25 = smov 256   ;;  %s567_s26 = smov 16  }
  0x19   :  { %37 = dma.hbm_to_vmem [thread:$0]  %s792_s2, 1280, %s32_s23, [#allocation6], %s566_s25, %s566_s25, %s567_s26  }
  0x1a   :  { %556 = dma.done.wait [#allocation3], 384  }
  0x1b   :  { %557 = vsyncadd [#allocation3], 4294966912 }
  0x1c   :  { %558 = dma.done.wait [#allocation6], 1280  }
  0x1d   :  { %559 = vsyncadd [#allocation6], 4294966016  ;;  %v48_v0 = vld [vmem:[#allocation2 + $0x8] sm:$0xf]  ;;  %v614_v1 = vld [vmem:[#allocation2] sm:$0xff]  ;;  %s568_s1 = smov 94  }
  0x1e   :  { %136 = vrot.lane.b32.xlu1 %v48_v0, %s568_s1  ;;  %132 = vrot.lane.b32.xlu0 %v614_v1, %s568_s1  ;;  %s569_s29 = smov 110   ;;  %s570_s30 = smov 111   ;;  %v622_v2 = vcombine.high %v614_v1, %v614_v1  ;;  %v54_v3 = vcombine.low %v48_v0, %v48_v0  ;;  %v53_v4 = vcombine.low %v614_v1, %v614_v1  ;;  %v641_v5 = vld [vmem:[#allocation2 + $0xc] sm:$0xff]  ;;  %v174_v7 = vld [vmem:[#allocation2 + $0x14] sm:$0xf]  ;;  %v576_v10 = vmov 0  }
  0x1f   :  { %s571_s2 = smov 96   ;;  %s572_s5 = smov 95   ;;  %v647_v6 = vcombine.high %v641_v5, %v641_v5  ;;  %v180_v8 = vcombine.low %v174_v7, %v174_v7  ;;  %v179_v9 = vcombine.low %v641_v5, %v641_v5  ;;  %341 = vmatprep.mubr.bf16.mxu0 %v576_v10  ;;  %382 = vmatprep.mubr.bf16.mxu1 %v576_v10  ;;  %vm138_vm0 = vcmask 769024   ;;  %v160_v15 = vld [vmem:[#allocation5 + $0x40] sm:$0xf]  ;;  %v702_v32 = vld [vmem:[#allocation5 + $0x28] sm:$0xff] }
  0x20   :  { %s573_s6 = smov 127   ;;  %s574_s7 = smov 126   ;;  %486 = vset.pattern.permute.xlu1 %v576_v10  ;;  %v161_v16 = vld [vmem:[#allocation5 + $0x48] sm:$0xf]  ;;  %vm296_vm1 = vcmask 1041408   ;;  %vm105_vm2 = vcmask 900096  }
  0x21   :  { %s575_s8 = smov 112   ;;  %vm94_vm3 = vcmask 908288   ;;  %vm143_vm4 = vcmask 1043456   ;;  %vm116_vm5 = vcmask 785408   ;;  %vm127_vm6 = vcmask 777216   ;;  %v705_v35 = vld [vmem:[#allocation5 + $0x38] sm:$0xff] }
  0x22   :  { %101 = vrot.lane.b32.xlu1 %v614_v1, %s569_s29  ;;  %92 = vrot.lane.b32.xlu0 %v48_v0, %s570_s30  ;;  %v714_v47 = vld [vmem:[#allocation5 + $0x20] sm:$0xff]  ;;  %v717_v50 = vld [vmem:[#allocation5 + $0x30] sm:$0xff]  ;;  %vm61_vm7 = vcmask 1039360   ;;  %vm72_vm8 = vcmask 1031168   ;;  %vm83_vm9 = vcmask 916480   ;;  %vm292_vm10 = vcmask 293888  }
  0x23   :  { %s578_s12 = smov 1   ;;  %s579_s13 = smov [#allocation7]  }
  0x24   :  { %s451_s14 = sshll.u32 %s579_s13, 4  ;;  %s452_s14 = int_to_ptr.vmem [resolvable:$true] %s451_s14 }
  0x25   :  { %p541_p11 = scmp.lt.s32.totalorder %s452_s14, %s452_s14 }
  0x26   :  { %90 = vrot.lane.b32.xlu1 %v622_v2, %s570_s30  ;;  %134 = vrot.lane.b32.xlu0 %v622_v2, %s568_s1 }
  0x2a   :  { %112 = vrot.lane.b32.xlu1 %v622_v2, %s571_s2  ;;  %103 = vrot.lane.b32.xlu0 %v54_v3, %s569_s29 }
  0x2e   :  { %123 = vrot.lane.b32.xlu1 %v614_v1, %s572_s5  ;;  %114 = vrot.lane.b32.xlu0 %v48_v0, %s571_s2 }
  0x32   :  { %88 = vrot.lane.b32.xlu1 %v614_v1, %s570_s30  ;;  %125 = vrot.lane.b32.xlu0 %v54_v3, %s572_s5 }
  0x36   :  { %110 = vrot.lane.b32.xlu1 %v614_v1, %s571_s2  ;;  %99 = vrot.lane.b32.xlu0 %v53_v4, %s569_s29 }
  0x3a   :  { %251 = vrot.lane.b32.xlu1 %v641_v5, %s568_s1  ;;  %121 = vrot.lane.b32.xlu0 %v53_v4, %s572_s5 }
  0x3e   :  { %255 = vrot.lane.b32.xlu1 %v174_v7, %s568_s1  ;;  %253 = vrot.lane.b32.xlu0 %v647_v6, %s568_s1 }
  0x42   :  { %59 = vrot.lane.b32.xlu1 %v54_v3, %s573_s6  ;;  %57 = vrot.lane.b32.xlu0 %v614_v1, %s573_s6 }
  0x46   :  { %70 = vrot.lane.b32.xlu1 %v48_v0, %s574_s7  ;;  %68 = vrot.lane.b32.xlu0 %v622_v2, %s574_s7 }
  0x4a   :  { %81 = vrot.lane.b32.xlu1 %v54_v3, %s575_s8  ;;  %79 = vrot.lane.b32.xlu0 %v614_v1, %s575_s8 }
  0x4e   :  { %215 = vrot.lane.b32.xlu1 %v174_v7, %s570_s30  ;;  %213 = vrot.lane.b32.xlu0 %v647_v6, %s570_s30 }
  0x52   :  { %225 = vrot.lane.b32.xlu1 %v180_v8, %s569_s29  ;;  %223 = vrot.lane.b32.xlu0 %v641_v5, %s569_s29 }
  0x56   :  { %235 = vrot.lane.b32.xlu1 %v174_v7, %s571_s2  ;;  %233 = vrot.lane.b32.xlu0 %v647_v6, %s571_s2 }
  0x5a   :  { %245 = vrot.lane.b32.xlu1 %v180_v8, %s572_s5  ;;  %243 = vrot.lane.b32.xlu0 %v641_v5, %s572_s5 }
  0x5e   :  { %66 = vrot.lane.b32.xlu1 %v614_v1, %s574_s7  ;;  %55 = vrot.lane.b32.xlu0 %v53_v4, %s573_s6 }
  0x62   :  { %211 = vrot.lane.b32.xlu1 %v641_v5, %s570_s30  ;;  %77 = vrot.lane.b32.xlu0 %v53_v4, %s575_s8 }
  0x66   :  { %231 = vrot.lane.b32.xlu1 %v641_v5, %s571_s2  ;;  %221 = vrot.lane.b32.xlu0 %v179_v9, %s569_s29 }
  0x6a   :  { %183 = vrot.lane.b32.xlu1 %v641_v5, %s573_s6  ;;  %241 = vrot.lane.b32.xlu0 %v179_v9, %s572_s5 }
  0x6e   :  { %193 = vrot.lane.b32.xlu1 %v647_v6, %s574_s7  ;;  %185 = vrot.lane.b32.xlu0 %v180_v8, %s573_s6 }
  0x72   :  { %203 = vrot.lane.b32.xlu1 %v641_v5, %s575_s8  ;;  %195 = vrot.lane.b32.xlu0 %v174_v7, %s574_s7 }
  0x76   :  { %181 = vrot.lane.b32.xlu1 %v179_v9, %s573_s6  ;;  %205 = vrot.lane.b32.xlu0 %v180_v8, %s575_s8 }
  0x7a   :  { %201 = vrot.lane.b32.xlu1 %v179_v9, %s575_s8  ;;  %191 = vrot.lane.b32.xlu0 %v641_v5, %s574_s7 }
  0x90   :  { %v137_v11 = vpop.permute.xlu1 %136  ;;  %v133_v12 = vpop.permute.xlu0 %132 }
  0x94   :  { %v102_v13 = vpop.permute.xlu1 %101  ;;  %v93_v14 = vpop.permute.xlu0 %92 }
  0x98   :  { %v91_v17 = vpop.permute.xlu1 %90  ;;  %v135_v18 = vpop.permute.xlu0 %134 }
  0x99   :  { %v139_v19 = vsel %vm138_vm0, %v133_v12, %v135_v18  ;;  %v140_v20 = vsel %vm138_vm0, %v135_v18, %v137_v11  ;;  %v96_v31 = vsel %vm94_vm3, %v91_v17, %v93_v14  ;;  %v729_v12 = vld [vmem:[#allocation5 + $0x8] sm:$0xff] }
  0x9a   :  { %v170_v21 = vmul.f32 %v160_v15, %v139_v19  ;;  %v171_v22 = vmul.f32 %v161_v16, %v140_v20 }
  0x9c   :  { %v113_v23 = vpop.permute.xlu1 %112  ;;  %v104_v24 = vpop.permute.xlu0 %103  ;;  %v289_v25 = vpack.c.bf16 %v171_v22, %v171_v22  ;;  %v288_v26 = vpack.c.bf16 %v170_v21, %v170_v21 }
  0x9d   :  { %v107_v30 = vsel %vm105_vm2, %v102_v13, %v104_v24 }
  0x9e   :  { %464 = vmatprep.subr.msk.bf16.mxu0 %vm296_vm1, %v289_v25  ;;  %v298_v27 = vsel %vm296_vm1, %v288_v26, 0  ;;  %v149_v33 = vsel %vm143_vm4, %v96_v31, %v107_v30 }
  0x9f   :  { %320 = vmatpush1.bf16.msra.mxu0 %v298_v27  ;;  %v167_v40 = vmul.f32 %v702_v32, %v149_v33 }
  0xa0   :  { %v124_v28 = vpop.permute.xlu1 %123  ;;  %v115_v29 = vpop.permute.xlu0 %114 }
  0xa1   :  { %v118_v37 = vsel %vm116_vm5, %v113_v23, %v115_v29 }
  0xa4   :  { %v89_v34 = vpop.permute.xlu1 %88  ;;  %v126_v36 = vpop.permute.xlu0 %125 }
  0xa5   :  { %v129_v38 = vsel %vm127_vm6, %v124_v28, %v126_v36  ;;  %v95_v46 = vsel %vm94_vm3, %v89_v34, %v91_v17 }
  0xa6   :  { %v151_v39 = vsel %vm143_vm4, %v118_v37, %v129_v38 }
  0xa7   :  { %v169_v41 = vmul.f32 %v705_v35, %v151_v39 }
  0xa8   :  { %v111_v42 = vpop.permute.xlu1 %110  ;;  %v100_v43 = vpop.permute.xlu0 %99 }
  0xa9   :  { %v106_v44 = vsel %vm105_vm2, %v100_v43, %v102_v13  ;;  %v285_v45 = vpack.c.bf16 %v169_v41, %v167_v40  ;;  %v117_v52 = vsel %vm116_vm5, %v111_v42, %v113_v23 }
  0xaa   :  { %v148_v48 = vsel %vm143_vm4, %v95_v46, %v106_v44  ;;  %v152_v44 = vld [vmem:[#allocation5] sm:$0xff] }
  0xab   :  { %321 = vmatprep.subr.bf16.mxu0 %v285_v45  ;;  %v166_v55 = vmul.f32 %v714_v47, %v148_v48  ;;  %v154_v48 = vld [vmem:[#allocation5 + $0x10] sm:$0xff] }
  0xac   :  { %v252_v49 = vpop.permute.xlu1 %251  ;;  %v122_v51 = vpop.permute.xlu0 %121 }
  0xad   :  { %v128_v53 = vsel %vm127_vm6, %v122_v51, %v124_v28 }
  0xae   :  { %v150_v54 = vsel %vm143_vm4, %v117_v52, %v128_v53 }
  0xaf   :  { %v168_v56 = vmul.f32 %v717_v50, %v150_v54 }
  0xb0   :  { %v256_v57 = vpop.permute.xlu1 %255  ;;  %v254_v58 = vpop.permute.xlu0 %253 }
  0xb1   :  { %v257_v59 = vsel %vm138_vm0, %v252_v49, %v254_v58  ;;  %v258_v60 = vsel %vm138_vm0, %v254_v58, %v256_v57  ;;  %v284_v61 = vpack.c.bf16 %v168_v56, %v166_v55 }
  0xb2   :  { %v277_v62 = vmul.f32 %v257_v59, %v160_v15  ;;  %v278_v63 = vmul.f32 %v258_v60, %v161_v16  ;;  %v733_v15 = vld [vmem:[#allocation5 + $0x18] sm:$0xff] }
  0xb3   :  { %322 = vmatpush1.bf16.msra.mxu0 %v284_v61 }
  0xb4   :  { %v60_v0 = vpop.permute.xlu1 %59  ;;  %v58_v3 = vpop.permute.xlu0 %57  ;;  %v291_v4 = vpack.c.bf16 %v278_v63, %v278_v63  ;;  %v290_v7 = vpack.c.bf16 %v277_v62, %v277_v62 }
  0xb5   :  { %v63_v11 = vsel %vm61_vm7, %v58_v3, %v60_v0 }
  0xb6   :  { %466 = vmatprep.subr.msk.bf16.mxu1 %vm296_vm1, %v291_v4  ;;  %v304_v8 = vsel %vm296_vm1, %v290_v7, 0  ;;  %v145_v13 = vsel %vm143_vm4, %v622_v2, %v63_v11 }
  0xb7   :  { %361 = vmatpush1.bf16.msra.mxu1 %v304_v8  ;;  %v163_v20 = vmul.f32 %v729_v12, %v145_v13 }
  0xb8   :  { %v71_v9 = vpop.permute.xlu1 %70  ;;  %v69_v10 = vpop.permute.xlu0 %68 }
  0xb9   :  { %v74_v17 = vsel %vm72_vm8, %v69_v10, %v71_v9 }
  0xbc   :  { %v82_v14 = vpop.permute.xlu1 %81  ;;  %v80_v16 = vpop.permute.xlu0 %79 }
  0xbd   :  { %v85_v18 = vsel %vm83_vm9, %v80_v16, %v82_v14 }
  0xbe   :  { %v147_v19 = vsel %vm143_vm4, %v74_v17, %v85_v18 }
  0xbf   :  { %v165_v21 = vmul.f32 %v733_v15, %v147_v19 }
  0xc0   :  { %v216_v22 = vpop.permute.xlu1 %215  ;;  %v214_v23 = vpop.permute.xlu0 %213 }
  0xc1   :  { %v281_v24 = vpack.c.bf16 %v165_v21, %v163_v20  ;;  %v218_v29 = vsel %vm94_vm3, %v214_v23, %v216_v22 }
  0xc3   :  { %323 = vmatprep.subr.bf16.mxu0 %v281_v24 }
  0xc4   :  { %v226_v25 = vpop.permute.xlu1 %225  ;;  %v224_v2 = vpop.permute.xlu0 %223 }
  0xc5   :  { %v228_v28 = vsel %vm105_vm2, %v224_v2, %v226_v25 }
  0xc6   :  { %v266_v30 = vsel %vm143_vm4, %v218_v29, %v228_v28 }
  0xc7   :  { %v274_v38 = vmul.f32 %v266_v30, %v702_v32 }
  0xc8   :  { %v236_v26 = vpop.permute.xlu1 %235  ;;  %v234_v27 = vpop.permute.xlu0 %233 }
  0xc9   :  { %v238_v34 = vsel %vm116_vm5, %v234_v27, %v236_v26 }
  0xcc   :  { %v246_v31 = vpop.permute.xlu1 %245  ;;  %v244_v33 = vpop.permute.xlu0 %243 }
  0xcd   :  { %v248_v36 = vsel %vm127_vm6, %v244_v33, %v246_v31 }
  0xce   :  { %v268_v37 = vsel %vm143_vm4, %v238_v34, %v248_v36 }
  0xcf   :  { %v276_v39 = vmul.f32 %v268_v37, %v705_v35 }
  0xd0   :  { %v67_v40 = vpop.permute.xlu1 %66  ;;  %v56_v41 = vpop.permute.xlu0 %55 }
  0xd1   :  { %v62_v42 = vsel %vm61_vm7, %v56_v41, %v58_v3  ;;  %v287_v43 = vpack.c.bf16 %v276_v39, %v274_v38  ;;  %v73_v51 = vsel %vm72_vm8, %v67_v40, %v69_v10 }
  0xd2   :  { %v144_v45 = vsel %vm143_vm4, %v614_v1, %v62_v42  ;;  %v279_v1 = vld [vmem:[%s790_s0] sm:$0xf] }
  0xd3   :  { %362 = vmatprep.subr.bf16.mxu1 %v287_v43  ;;  %v162_v35 = vmul.f32 %v152_v44, %v144_v45 }
  0xd4   :  { %v212_v46 = vpop.permute.xlu1 %211  ;;  %v78_v49 = vpop.permute.xlu0 %77 }
  0xd5   :  { %v84_v52 = vsel %vm83_vm9, %v78_v49, %v80_v16  ;;  %v217_v58 = vsel %vm94_vm3, %v212_v46, %v214_v23 }
  0xd6   :  { %v146_v32 = vsel %vm143_vm4, %v73_v51, %v84_v52 }
  0xd7   :  { %v164_v53 = vmul.f32 %v154_v48, %v146_v32 }
  0xd8   :  { %v232_v54 = vpop.permute.xlu1 %231  ;;  %v222_v55 = vpop.permute.xlu0 %221 }
  0xd9   :  { %v227_v56 = vsel %vm105_vm2, %v222_v55, %v224_v2  ;;  %v280_v57 = vpack.c.bf16 %v164_v53, %v162_v35  ;;  %v237_v62 = vsel %vm116_vm5, %v232_v54, %v234_v27  ;;  %v577_v54 = vmov 1   ;;  %v409_v55 = vld [vmem:[%s793_s3] sm:$0xff]  ;;  %s536_s3 = scalar_lea.vmem %s452_s14, 512 }
  0xda   :  { %v265_v59 = vsel %vm143_vm4, %v217_v58, %v227_v56  ;;  %487 = vset.pattern.permute.xlu0 %v577_v54  ;;  %p537_p10 = scmp.ne.s32.totalorder %s452_s14, %s536_s3  ;;  %p542_p12 = scmp.lt.s32.totalorder %s536_s3, %s536_s3 }
  0xdb   :  { %324 = vmatpush1.bf16.msra.mxu0 %v280_v57  ;;  %v273_v3 = vmul.f32 %v265_v59, %v714_v47 }
  0xdc   :  { %v184_v60 = vpop.permute.xlu1 %183  ;;  %v242_v61 = vpop.permute.xlu0 %241  ;;  %p543_p13 = por %p542_p12, %p541_p11 }
  0xdd   :  { %v247_v63 = vsel %vm127_vm6, %v242_v61, %v244_v33 }
  0xde   :  { %v267_v0 = vsel %vm143_vm4, %v237_v62, %v247_v63  ;;  %465 = vmatmul.mubr.msk.bf16.vlgmr.msra.gmra.mxu0 %vm292_vm10, %v279_v1  ;;  %p544_p0 = pnand %p543_p13, %p537_p10 }
  0xdf   :  { %v275_v4 = vmul.f32 %v267_v0, %v717_v50 }
  0xe0   :  { %v194_v7 = vpop.permute.xlu1 %193  ;;  %v186_v8 = vpop.permute.xlu0 %185 }
  0xe1   :  { %v286_v9 = vpack.c.bf16 %v275_v4, %v273_v3  ;;  %v188_v13 = vsel %vm61_vm7, %v184_v60, %v186_v8 }
  0xe2   :  { %v262_v14 = vsel %vm143_vm4, %v647_v6, %v188_v13 }
  0xe3   :  { %363 = vmatpush1.bf16.msra.mxu1 %v286_v9  ;;  %v270_v20 = vmul.f32 %v262_v14, %v729_v12 }
  0xe4   :  { %v204_v10 = vpop.permute.xlu1 %203  ;;  %v196_v11 = vpop.permute.xlu0 %195 }
  0xe5   :  { %v198_v18 = vsel %vm72_vm8, %v194_v7, %v196_v11 }
  0xe8   :  { %v182_v16 = vpop.permute.xlu1 %181  ;;  %v206_v17 = vpop.permute.xlu0 %205 }
  0xe9   :  { %v187_v19 = vsel %vm61_vm7, %v182_v16, %v184_v60  ;;  %v208_v47 = vsel %vm83_vm9, %v204_v10, %v206_v17 }
  0xea   :  { %v264_v50 = vsel %vm143_vm4, %v198_v18, %v208_v47  ;;  %v261_v22 = vsel %vm143_vm4, %v641_v5, %v187_v19 }
  0xeb   :  { %v272_v21 = vmul.f32 %v264_v50, %v733_v15  ;;  %v269_v27 = vmul.f32 %v261_v22, %v152_v44 }
  0xec   :  { %v202_v23 = vpop.permute.xlu1 %201  ;;  %v192_v24 = vpop.permute.xlu0 %191 }
  0xed   :  { %v207_v6 = vsel %vm83_vm9, %v202_v23, %v204_v10  ;;  %v197_v25 = vsel %vm72_vm8, %v192_v24, %v194_v7  ;;  %v283_v2 = vpack.c.bf16 %v272_v21, %v270_v20 }
  0xee   :  { %v263_v26 = vsel %vm143_vm4, %v197_v25, %v207_v6 }
  0xef   :  { %v271_v28 = vmul.f32 %v263_v26, %v154_v48  ;;  %364 = vmatprep.subr.bf16.mxu1 %v283_v2 }
  0xf1   :  { %v282_v29 = vpack.c.bf16 %v271_v28, %v269_v27 }
  0xf3   :  { %365 = vmatpush1.bf16.msra.mxu1 %v282_v29 }
  0xf6   :  { %467 = vmatmul.mubr.msk.bf16.vlgmr.msra.gmra.mxu1 %vm292_vm10, %v279_v1 }
 0x19e   :  { %v343_v12 = vpop.f32.mrf.mxu0 }
 0x19f   :  { %v396_v31 = vmul.f32 %v343_v12, %v343_v12 }
 0x1a0   :  { %v345_v15 = vpop.f32.mrf.mxu0 }
 0x1a1   :  { %v397_v33 = vmul.f32 %v345_v15, %v345_v15  ;;  %v391_v34 = vadd.f32 %v345_v15, %v343_v12 }
 0x1a2   :  { %v347_v30 = vpop.f32.mrf.mxu0 }
 0x1a3   :  { %v400_v39 = vadd.f32 %v397_v33, %v396_v31 }
 0x1a4   :  { %v348_v5 = vpop.f32.mrf.mxu0 }
 0x1b6   :  { %v384_v36 = vpop.f32.mrf.mxu1 }
 0x1b7   :  { %v398_v37 = vmul.f32 %v384_v36, %v384_v36  ;;  %v392_v38 = vadd.f32 %v391_v34, %v384_v36 }
 0x1b8   :  { %v386_v40 = vpop.f32.mrf.mxu1 }
 0x1b9   :  { %v393_v41 = vadd.f32 %v392_v38, %v386_v40  ;;  %v399_v42 = vmul.f32 %v386_v40, %v386_v40  ;;  %v401_v43 = vadd.f32 %v400_v39, %v398_v37 }
 0x1ba   :  { %v388_v44 = vpop.f32.mrf.mxu1 }
 0x1bb   :  { %394 = vadd.xlane.f32.xlu0 %v393_v41  ;;  %v402_v45 = vadd.f32 %v401_v43, %v399_v42 }
 0x1bc   :  { %v389_v46 = vpop.f32.mrf.mxu1 }
 0x1bd   :  { %403 = vadd.xlane.f32.xlu1 %v402_v45 }
 0x244   :  { %v395_v48 = vpop.xlane.xlu0 %394 }
 0x245   :  { %v405_v49 = vmul.f32 0.001953125, %v395_v48 }
 0x246   :  { %v404_v51 = vpop.xlane.xlu1 %403 }
 0x247   :  { %v407_v52 = vmul.f32 %v405_v49, %v405_v49  ;;  %v406_v32 = vmul.f32 0.001953125, %v404_v51 }
 0x249   :  { %v408_v35 = vsub.f32 %v406_v32, %v407_v52 }
 0x24b   :  { %v410_v53 = vadd.f32 1e-05, %v408_v35 }
 0x24d   :  { %494 = vrsqrt.f32 %v410_v53 }
 0x25a   :  { %v495_v56 = vpop.eup %494 }
 0x25b   :  { %v412_v57 = vmul.f32 %v495_v56, %v409_v55 }
 0x25d   :  { %421 = vperm.xlu1 %486, %v412_v57   ;;  %v413_v58 = vmul.f32 %v412_v57, %v405_v49 }
 0x25f   :  { %415 = vrot.lane.b32.xlu0 %v413_v58, %s578_s12 }
 0x2d1   :  { %v416_v1 = vpop.permute.xlu0 %415 }
 0x2d2   :  { %v418_v59 = vsub.f32 %v409_v55, %v416_v1 }
 0x2d4   :  { %430 = vperm.xlu0 %487, %v418_v59  }
 0x2d8   :  { %v422_v60 = vpop.permute.xlu1 %421 }
 0x2d9   :  { %v424_v61 = vmul.f32 %v422_v60, %v343_v12  ;;  %v425_v62 = vmul.f32 %v422_v60, %v345_v15  ;;  %v426_v63 = vmul.f32 %v422_v60, %v384_v36  ;;  %v427_v0 = vmul.f32 %v422_v60, %v386_v40 }
 0x34f   :  { %v431_v3 = vpop.permute.xlu0 %430 }
 0x350   :  { %v433_v4 = vadd.f32 %v431_v3, %v424_v61  ;;  %v434_v7 = vadd.f32 %v431_v3, %v425_v62  ;;  %v435_v8 = vadd.f32 %v431_v3, %v426_v63  ;;  %v436_v9 = vadd.f32 %v431_v3, %v427_v0 }
 0x352   :  { %v437_v10 = vmax.f32 %v433_v4, 0.0  ;;  %v438_v11 = vmax.f32 %v434_v7, 0.0  ;;  %v439_v13 = vmax.f32 %v435_v8, 0.0  ;;  %v440_v14 = vmax.f32 %v436_v9, 0.0 }
 0x354   :  { %441 = vst [vmem:[#allocation7] sm:$0xff] %v437_v10  ;;  %442 = vst [vmem:[#allocation7 + $0x8] sm:$0xff] %v438_v11 }
 0x355   :  { %444 = vst [vmem:[#allocation7 + $0x10] sm:$0xff] %v439_v13  ;;  %445 = vst [vmem:[#allocation7 + $0x18] sm:$0xff] %v440_v14 }
 0x356   :  { %547 = shalt.err (!%p544_p0)
}
 0x357   :  { %457 = dma.vmem_to_hbm [thread:$0]  %s452_s14, 512, %s794_s4, [#allocation4], %s566_s25, %s566_s25, %s567_s26  }
 0x358   :  { %560 = dma.done.wait [#allocation4], 512  }
 0x359   :  { %561 = vsyncadd [#allocation4], 4294966784 }
 0x35a   :  { %461 = vsyncpa [#allocation3], 1 }
 0x35b   :  { %462 = vsyncpa [#allocation6], 1 }
 0x35c   :  { %463 = vsyncpa [#allocation4], 1 }

</bundles_post_ra>
